<compile_context>
chip_gen: v7x
topology: tpu7x:2x2x1
jax: 0.10.0
libtpu: 0.0.40
codegen_flags: <defaults>
</compile_context>

<pallas_src>
import functools
import math

import jax
import jax.numpy as jnp
from jax.experimental import pallas as pl
from jax.experimental.pallas import tpu as pltpu


def _lstm_seq_kernel(x_ref, h0_ref, c0_ref, wih_ref, whh_ref, b_ref,
                     out_ref, state_ref, h_scr, c_scr, *, U, H, T):
    """One grid step == U LSTM timesteps.  x_ref:(U,E) out_ref:(U,H)."""
    tb = pl.program_id(0)
    n_blk = pl.num_programs(0)

    # Load the recurrent state into scratch on the first block.
    @pl.when(tb == 0)
    def _():
        h_scr[...] = h0_ref[...]
        c_scr[...] = c0_ref[...]

    # ---- Bulk input projection for the whole block (one MXU push, M = U) ----
    gx = (jnp.dot(x_ref[...], wih_ref[...], preferred_element_type=jnp.float32)
          + b_ref[...])                                   # (U, 4H)

    # Gate-type lane mask, hoisted out of the per-timestep loop.
    lane = jax.lax.broadcasted_iota(jnp.int32, (1, 4 * H), 1)
    is_g = jnp.logical_and(lane >= 2 * H, lane < 3 * H)

    needs_mask = (T % U) != 0                             # static (tail padding)

    h = h_scr[...]                                        # (1, H)
    c = c_scr[...]                                        # (1, H)
    outs = []
    for u in range(U):                                    # statically unrolled
        # Serial critical path: one small matmul + gate math per timestep.
        gates = gx[u:u + 1, :] + jnp.dot(h, whh_ref[...],
                                         preferred_element_type=jnp.float32)
        # Dense activation: g-lanes -> tanh, i/f/o -> 0.5*tanh(0.5*x)+0.5.
        th = jnp.tanh(jnp.where(is_g, gates, 0.5 * gates))   # single EUP pass
        act = jnp.where(is_g, th, 0.5 * th + 0.5)

        i_g = act[:, 0 * H:1 * H]
        f_g = act[:, 1 * H:2 * H]
        g_g = act[:, 2 * H:3 * H]
        o_g = act[:, 3 * H:4 * H]

        c_new = f_g * c + i_g * g_g
        h_new = o_g * jnp.tanh(c_new)

        if needs_mask:
            # Do not advance the state on zero-padded tail timesteps.
            valid = tb * U + u < T
            h = jnp.where(valid, h_new, h)
            c = jnp.where(valid, c_new, c)
        else:
            h, c = h_new, c_new
        outs.append(h_new)

    h_scr[...] = h
    c_scr[...] = c
    # One block-dense writeback instead of U masked per-row stores.
    out_ref[...] = jnp.concatenate(outs, axis=0).astype(out_ref.dtype)

    # Emit final (h_n, c_n) once, packed in a single contiguous tile.
    @pl.when(tb == n_blk - 1)
    def _():
        state_ref[0] = h.astype(state_ref.dtype)
        state_ref[1] = c.astype(state_ref.dtype)


def lstm_seq_pallas(x, h0, c0, w_ih_t, w_hh_t, b, *, block_t=8):
    """Run a full LSTM sequence inside one pallas_call.

    x:      (T, 1, E)   (batch must be 1, matching the PyTorch module)
    h0, c0: (1, H)
    w_ih_t: (E, 4H)   w_hh_t: (H, 4H)   b: (1, 4H)  (b_ih + b_hh fused)
    Returns (lstm_out (T, 1, H), h_n (1, H), c_n (1, H)).
    """
    T, B, E = x.shape
    assert B == 1, "EncoderLSTM kernel is specialized to batch=1 (as in the spec)"
    # TODO(synk): general B support (un-squeeze the batch dim, M = U*B bulk matmul).
    H = h0.shape[-1]

    U = min(block_t, T)
    n_blk = pl.cdiv(T, U)
    T_pad = n_blk * U
    if T_pad != T:
        x = jnp.pad(x, ((0, T_pad - T), (0, 0), (0, 0)))

    def const_spec(shape):
        zeros = (0,) * len(shape)
        return pl.BlockSpec(shape, lambda t: zeros)   # resident, loaded once

    kernel = functools.partial(_lstm_seq_kernel, U=U, H=H, T=T)

    out, state = pl.pallas_call(
        kernel,
        grid=(n_blk,),
        in_specs=[
            # x streamed per time-block; batch dim squeezed -> kernel sees (U, E).
            pl.BlockSpec((U, None, E), lambda t: (t, 0, 0)),
            const_spec(h0.shape), const_spec(c0.shape),
            const_spec(w_ih_t.shape), const_spec(w_hh_t.shape),
            const_spec(b.shape),
        ],
        out_specs=(
            # lstm_out streamed per time-block -> kernel sees (U, H).
            pl.BlockSpec((U, None, H), lambda t: (t, 0, 0)),
            const_spec((2, 1, H)),
        ),
        out_shape=(jax.ShapeDtypeStruct((T_pad, 1, H), jnp.float32),
                   jax.ShapeDtypeStruct((2, 1, H), jnp.float32)),
        scratch_shapes=[pltpu.VMEM((1, H), jnp.float32),
                        pltpu.VMEM((1, H), jnp.float32)],
        compiler_params=pltpu.CompilerParams(
            # Time axis carries state in scratch -> must stay sequential.
            dimension_semantics=("arbitrary",),
            vmem_limit_bytes=32 * 1024 * 1024,
        ),
    )(x, h0, c0, w_ih_t, w_hh_t, b)

    if T_pad != T:
        out = out[:T]
    return out, state[0], state[1]


class EncoderLSTM:
    """JAX/Pallas port of the PyTorch EncoderLSTM module."""

    def __init__(self, embedding_dim, hidden_dim, key):
        self.embedding_dim = embedding_dim
        self.hidden_dim = hidden_dim
        k = 1.0 / math.sqrt(hidden_dim)
        k1, k2, k3, k4 = jax.random.split(key, 4)
        # PyTorch nn.LSTM parameter shapes: W_ih:(4H,E), W_hh:(4H,H), biases:(4H,)
        w_ih = jax.random.uniform(k1, (4 * hidden_dim, embedding_dim), jnp.float32, -k, k)
        w_hh = jax.random.uniform(k2, (4 * hidden_dim, hidden_dim), jnp.float32, -k, k)
        b_ih = jax.random.uniform(k3, (4 * hidden_dim,), jnp.float32, -k, k)
        b_hh = jax.random.uniform(k4, (4 * hidden_dim,), jnp.float32, -k, k)
        # Pre-transpose for the (row)@(in,4H) layout; fuse the two biases.
        self.w_ih_t = jnp.asarray(w_ih.T)                    # (E, 4H)
        self.w_hh_t = jnp.asarray(w_hh.T)                    # (H, 4H)
        self.b = (b_ih + b_hh).reshape(1, 4 * hidden_dim)    # (1, 4H)

    def init_hidden(self):
        return (jnp.zeros((1, 1, self.hidden_dim), jnp.float32),
                jnp.zeros((1, 1, self.hidden_dim), jnp.float32))

    def forward(self, inputs, hidden):
        # Mirrors inputs.view(1, 1, -1): a single (seq=1, batch=1) step.
        x = jnp.reshape(inputs, (1, 1, self.embedding_dim)).astype(jnp.float32)
        h0, c0 = hidden
        h0 = jnp.reshape(h0, (1, self.hidden_dim)).astype(jnp.float32)
        c0 = jnp.reshape(c0, (1, self.hidden_dim)).astype(jnp.float32)
        lstm_out, h_n, c_n = lstm_seq_pallas(x, h0, c0, self.w_ih_t, self.w_hh_t, self.b)
        return lstm_out, (h_n.reshape(1, 1, self.hidden_dim),
                          c_n.reshape(1, 1, self.hidden_dim))


def _ref_step(x, h, c, w_ih_t, w_hh_t, b):
    """Pure-JAX reference LSTM cell (standard sigmoid/tanh)."""
    H = h.shape[-1]
    gates = x @ w_ih_t + h @ w_hh_t + b
    i_g = jax.nn.sigmoid(gates[:, 0 * H:1 * H])
    f_g = jax.nn.sigmoid(gates[:, 1 * H:2 * H])
    g_g = jnp.tanh(gates[:, 2 * H:3 * H])
    o_g = jax.nn.sigmoid(gates[:, 3 * H:4 * H])
    c_new = f_g * c + i_g * g_g
    h_new = o_g * jnp.tanh(c_new)
    return h_new, c_new


def _ref_seq(xs, h0, c0, w_ih_t, w_hh_t, b):
    h, c = h0, c0
    outs = []
    for t in range(xs.shape[0]):
        h, c = _ref_step(xs[t], h, c, w_ih_t, w_hh_t, b)
        outs.append(h)
    return jnp.stack(outs, axis=0), h, c


if __name__ == "__main__":
    embedding_dim = 32
    hidden_dim = 32

    key = jax.random.PRNGKey(0)
    k_param, k_in, k_seq, k_seq2 = jax.random.split(key, 4)

    model = EncoderLSTM(embedding_dim, hidden_dim, k_param)

    # --- Module forward (seq_len=1, batch=1), same semantics as PyTorch spec ---
    hidden = model.init_hidden()
    inputs = jax.random.normal(k_in, (embedding_dim,), jnp.float32)
    lstm_out, (h_n, c_n) = model.forward(inputs, hidden)
    jax.block_until_ready((lstm_out, h_n, c_n))

    x2 = inputs.reshape(1, embedding_dim)
    h2 = hidden[0].reshape(1, hidden_dim)
    c2 = hidden[1].reshape(1, hidden_dim)
    h_ref, c_ref = _ref_step(x2, h2, c2, model.w_ih_t, model.w_hh_t, model.b)
    assert lstm_out.shape == (1, 1, hidden_dim)
    assert h_n.shape == (1, 1, hidden_dim) and c_n.shape == (1, 1, hidden_dim)
    assert jnp.allclose(lstm_out.reshape(1, hidden_dim), h_ref, atol=1e-5, rtol=1e-5)
    assert jnp.allclose(h_n.reshape(1, hidden_dim), h_ref, atol=1e-5, rtol=1e-5)
    assert jnp.allclose(c_n.reshape(1, hidden_dim), c_ref, atol=1e-5, rtol=1e-5)

    # --- Longer sequence, single time-block (T=8, U=8) ---
    T = 8
    xs = jax.random.normal(k_seq, (T, 1, embedding_dim), jnp.float32)
    h0 = jnp.zeros((1, hidden_dim), jnp.float32)
    c0 = jnp.zeros((1, hidden_dim), jnp.float32)
    out_seq, h_T, c_T = lstm_seq_pallas(xs, h0, c0, model.w_ih_t, model.w_hh_t, model.b)
    jax.block_until_ready((out_seq, h_T, c_T))
    out_ref, h_r, c_r = _ref_seq(xs, h0, c0, model.w_ih_t, model.w_hh_t, model.b)
    assert jnp.allclose(out_seq, out_ref, atol=1e-5, rtol=1e-5)
    assert jnp.allclose(h_T, h_r, atol=1e-5, rtol=1e-5)
    assert jnp.allclose(c_T, c_r, atol=1e-5, rtol=1e-5)

    # --- Multi-block streamed path with tail padding (T=13, U=4 -> 4 blocks) ---
    T2 = 13
    xs2 = jax.random.normal(k_seq2, (T2, 1, embedding_dim), jnp.float32)
    out_seq2, h_T2, c_T2 = lstm_seq_pallas(
        xs2, h0, c0, model.w_ih_t, model.w_hh_t, model.b, block_t=4)
    jax.block_until_ready((out_seq2, h_T2, c_T2))
    out_ref2, h_r2, c_r2 = _ref_seq(xs2, h0, c0, model.w_ih_t, model.w_hh_t, model.b)
    assert out_seq2.shape == (T2, 1, hidden_dim)
    assert jnp.allclose(out_seq2, out_ref2, atol=1e-5, rtol=1e-5)
    assert jnp.allclose(h_T2, h_r2, atol=1e-5, rtol=1e-5)
    assert jnp.allclose(c_T2, c_r2, atol=1e-5, rtol=1e-5)

    print("KERNEL_OK")
</pallas_src>

<mosaic_0001>
module attributes {stable_mosaic.version = 11 : i64} {
  func.func @_lstm_seq_kernel(%arg0: i32, %arg1: memref<1x1x32xf32, #tpu.memory_space<vmem>>, %arg2: memref<1x32xf32, #tpu.memory_space<vmem>>, %arg3: memref<1x32xf32, #tpu.memory_space<vmem>>, %arg4: memref<32x128xf32, #tpu.memory_space<vmem>>, %arg5: memref<32x128xf32, #tpu.memory_space<vmem>>, %arg6: memref<1x128xf32, #tpu.memory_space<vmem>>, %arg7: memref<1x1x32xf32, #tpu.memory_space<vmem>>, %arg8: memref<2x1x32xf32, #tpu.memory_space<vmem>>, %arg9: memref<1x32xf32, #tpu.memory_space<vmem>>, %arg10: memref<1x32xf32, #tpu.memory_space<vmem>>) attributes {dimension_semantics = [#tpu.dimension_semantics<arbitrary>], iteration_bounds = array<i64: 1>, scalar_prefetch = 0 : i64, scratch_operands = 2 : i64, tpu.core_type = #tpu.core_type<tc>, window_params = [{transform_indices = @transform_0, window_bounds = array<i64: 1, 1, 32>}, {pipeline_mode = #tpu.pipeline_mode<synchronous>, transform_indices = @transform_1, window_bounds = array<i64: 1, 32>}, {pipeline_mode = #tpu.pipeline_mode<synchronous>, transform_indices = @transform_2, window_bounds = array<i64: 1, 32>}, {pipeline_mode = #tpu.pipeline_mode<synchronous>, transform_indices = @transform_3, window_bounds = array<i64: 32, 128>}, {pipeline_mode = #tpu.pipeline_mode<synchronous>, transform_indices = @transform_4, window_bounds = array<i64: 32, 128>}, {pipeline_mode = #tpu.pipeline_mode<synchronous>, transform_indices = @transform_5, window_bounds = array<i64: 1, 128>}, {transform_indices = @transform_6, window_bounds = array<i64: 1, 1, 32>}, {pipeline_mode = #tpu.pipeline_mode<synchronous>, transform_indices = @transform_7, window_bounds = array<i64: 2, 1, 32>}]} {
    %c0_i32 = arith.constant 0 : i32
    %0 = arith.cmpi eq, %arg0, %c0_i32 : i32
    %1 = arith.extui %0 : i1 to i32
    %c0_i32_0 = arith.constant 0 : i32
    %2 = arith.cmpi ne, %1, %c0_i32_0 : i32
    scf.if %2 {
      %c0_26 = arith.constant 0 : index
      %c0_27 = arith.constant 0 : index
      %46 = vector.load %arg2[%c0_26, %c0_27] : memref<1x32xf32, #tpu.memory_space<vmem>>, vector<1x32xf32>
      %c0_28 = arith.constant 0 : index
      %c0_29 = arith.constant 0 : index
      %47 = vector.load %arg9[%c0_28, %c0_29] : memref<1x32xf32, #tpu.memory_space<vmem>>, vector<1x32xf32>
      tpu.vector_store %arg9[%c0_28, %c0_29], %46 {strides = array<i32>} : memref<1x32xf32, #tpu.memory_space<vmem>>, vector<1x32xf32>,
      %c0_30 = arith.constant 0 : index
      %c0_31 = arith.constant 0 : index
      %48 = vector.load %arg3[%c0_30, %c0_31] : memref<1x32xf32, #tpu.memory_space<vmem>>, vector<1x32xf32>
      %c0_32 = arith.constant 0 : index
      %c0_33 = arith.constant 0 : index
      %49 = vector.load %arg10[%c0_32, %c0_33] : memref<1x32xf32, #tpu.memory_space<vmem>>, vector<1x32xf32>
      tpu.vector_store %arg10[%c0_32, %c0_33], %48 {strides = array<i32>} : memref<1x32xf32, #tpu.memory_space<vmem>>, vector<1x32xf32>,
    } else {
    }
    %c0 = arith.constant 0 : index
    %c0_1 = arith.constant 0 : index
    %c0_2 = arith.constant 0 : index
    %3 = vector.load %arg1[%c0, %c0_1, %c0_2] : memref<1x1x32xf32, #tpu.memory_space<vmem>>, vector<1x1x32xf32>
    %4 = vector.shape_cast %3 : vector<1x1x32xf32> to vector<1x32xf32>
    %c0_3 = arith.constant 0 : index
    %c0_4 = arith.constant 0 : index
    %5 = vector.load %arg4[%c0_3, %c0_4] : memref<32x128xf32, #tpu.memory_space<vmem>>, vector<32x128xf32>
    %cst = arith.constant dense<0.000000e+00> : vector<1x128xf32>
    %6 = tpu.matmul %4, %5, %cst {dimension_numbers = #tpu.dot_dimension_numbers<[1], [0], [0], [1], [0, 0, 1, 1], [], []>} : vector<1x32xf32>, vector<32x128xf32>, vector<1x128xf32> -> vector<1x128xf32>
    %c0_5 = arith.constant 0 : index
    %c0_6 = arith.constant 0 : index
    %7 = vector.load %arg6[%c0_5, %c0_6] : memref<1x128xf32, #tpu.memory_space<vmem>>, vector<1x128xf32>
    %8 = arith.addf %6, %7 : vector<1x128xf32>
    %9 = tpu.iota {dimensions = array<i32: 1>} : vector<1x128xi32>
    %c64_i32 = arith.constant 64 : i32
    %10 = vector.broadcast %c64_i32 : i32 to vector<1x128xi32>
    %11 = arith.cmpi sge, %9, %10 : vector<1x128xi32>
    %c96_i32 = arith.constant 96 : i32
    %12 = vector.broadcast %c96_i32 : i32 to vector<1x128xi32>
    %13 = arith.cmpi slt, %9, %12 : vector<1x128xi32>
    %14 = arith.andi %11, %13 : vector<1x128xi1>
    %c0_7 = arith.constant 0 : index
    %c0_8 = arith.constant 0 : index
    %15 = vector.load %arg9[%c0_7, %c0_8] : memref<1x32xf32, #tpu.memory_space<vmem>>, vector<1x32xf32>
    %c0_9 = arith.constant 0 : index
    %c0_10 = arith.constant 0 : index
    %16 = vector.load %arg10[%c0_9, %c0_10] : memref<1x32xf32, #tpu.memory_space<vmem>>, vector<1x32xf32>
    %c0_11 = arith.constant 0 : index
    %c0_12 = arith.constant 0 : index
    %17 = vector.load %arg5[%c0_11, %c0_12] : memref<32x128xf32, #tpu.memory_space<vmem>>, vector<32x128xf32>
    %cst_13 = arith.constant dense<0.000000e+00> : vector<1x128xf32>
    %18 = tpu.matmul %15, %17, %cst_13 {dimension_numbers = #tpu.dot_dimension_numbers<[1], [0], [0], [1], [0, 0, 1, 1], [], []>} : vector<1x32xf32>, vector<32x128xf32>, vector<1x128xf32> -> vector<1x128xf32>
    %19 = arith.addf %8, %18 : vector<1x128xf32>
    %cst_14 = arith.constant 5.000000e-01 : f32
    %20 = vector.broadcast %cst_14 : f32 to vector<1x128xf32>
    %21 = arith.mulf %20, %19 : vector<1x128xf32>
    %22 = arith.select %14, %19, %21 : vector<1x128xi1>, vector<1x128xf32>
    %23 = math.tanh %22 : vector<1x128xf32>
    %cst_15 = arith.constant 5.000000e-01 : f32
    %24 = vector.broadcast %cst_15 : f32 to vector<1x128xf32>
    %25 = arith.mulf %24, %23 : vector<1x128xf32>
    %cst_16 = arith.constant 5.000000e-01 : f32
    %26 = vector.broadcast %cst_16 : f32 to vector<1x128xf32>
    %27 = arith.addf %25, %26 : vector<1x128xf32>
    %28 = arith.select %14, %23, %27 : vector<1x128xi1>, vector<1x128xf32>
    %29 = vector.extract_strided_slice %28 {offsets = [0, 0], sizes = [1, 32], strides = [1, 1]} : vector<1x128xf32> to vector<1x32xf32>
    %30 = vector.extract_strided_slice %28 {offsets = [0, 32], sizes = [1, 32], strides = [1, 1]} : vector<1x128xf32> to vector<1x32xf32>
    %31 = vector.extract_strided_slice %28 {offsets = [0, 64], sizes = [1, 32], strides = [1, 1]} : vector<1x128xf32> to vector<1x32xf32>
    %32 = vector.extract_strided_slice %28 {offsets = [0, 96], sizes = [1, 32], strides = [1, 1]} : vector<1x128xf32> to vector<1x32xf32>
    %33 = arith.mulf %30, %16 : vector<1x32xf32>
    %34 = arith.mulf %29, %31 : vector<1x32xf32>
    %35 = arith.addf %33, %34 : vector<1x32xf32>
    %36 = math.tanh %35 : vector<1x32xf32>
    %37 = arith.mulf %32, %36 : vector<1x32xf32>
    %c0_17 = arith.constant 0 : index
    %c0_18 = arith.constant 0 : index
    %38 = vector.load %arg9[%c0_17, %c0_18] : memref<1x32xf32, #tpu.memory_space<vmem>>, vector<1x32xf32>
    tpu.vector_store %arg9[%c0_17, %c0_18], %37 {strides = array<i32>} : memref<1x32xf32, #tpu.memory_space<vmem>>, vector<1x32xf32>,
    %c0_19 = arith.constant 0 : index
    %c0_20 = arith.constant 0 : index
    %39 = vector.load %arg10[%c0_19, %c0_20] : memref<1x32xf32, #tpu.memory_space<vmem>>, vector<1x32xf32>
    tpu.vector_store %arg10[%c0_19, %c0_20], %35 {strides = array<i32>} : memref<1x32xf32, #tpu.memory_space<vmem>>, vector<1x32xf32>,
    %c0_21 = arith.constant 0 : index
    %c0_22 = arith.constant 0 : index
    %c0_23 = arith.constant 0 : index
    %40 = vector.load %arg7[%c0_21, %c0_22, %c0_23] : memref<1x1x32xf32, #tpu.memory_space<vmem>>, vector<1x1x32xf32>
    %41 = vector.shape_cast %40 : vector<1x1x32xf32> to vector<1x32xf32>
    %42 = vector.shape_cast %37 : vector<1x32xf32> to vector<1x1x32xf32>
    tpu.vector_store %arg7[%c0_21, %c0_22, %c0_23], %42 {strides = array<i32>} : memref<1x1x32xf32, #tpu.memory_space<vmem>>, vector<1x1x32xf32>,
    %c0_i32_24 = arith.constant 0 : i32
    %43 = arith.cmpi eq, %arg0, %c0_i32_24 : i32
    %44 = arith.extui %43 : i1 to i32
    %c0_i32_25 = arith.constant 0 : i32
    %45 = arith.cmpi ne, %44, %c0_i32_25 : i32
    scf.if %45 {
      %c0_26 = arith.constant 0 : index
      %c0_27 = arith.constant 0 : index
      %c0_28 = arith.constant 0 : index
      %46 = vector.load %arg8[%c0_26, %c0_27, %c0_28] : memref<2x1x32xf32, #tpu.memory_space<vmem>>, vector<1x1x32xf32>
      %47 = vector.shape_cast %46 : vector<1x1x32xf32> to vector<1x32xf32>
      %48 = vector.shape_cast %37 : vector<1x32xf32> to vector<1x1x32xf32>
      tpu.vector_store %arg8[%c0_26, %c0_27, %c0_28], %48 {strides = array<i32>} : memref<2x1x32xf32, #tpu.memory_space<vmem>>, vector<1x1x32xf32>,
      %c1 = arith.constant 1 : index
      %c0_29 = arith.constant 0 : index
      %c0_30 = arith.constant 0 : index
      %49 = vector.load %arg8[%c1, %c0_29, %c0_30] : memref<2x1x32xf32, #tpu.memory_space<vmem>>, vector<1x1x32xf32>
      %50 = vector.shape_cast %49 : vector<1x1x32xf32> to vector<1x32xf32>
      %51 = vector.shape_cast %35 : vector<1x32xf32> to vector<1x1x32xf32>
      tpu.vector_store %arg8[%c1, %c0_29, %c0_30], %51 {strides = array<i32>} : memref<2x1x32xf32, #tpu.memory_space<vmem>>, vector<1x1x32xf32>,
    } else {
    }
    return
  }
  func.func @transform_0(%arg0: i32) -> (i32, i32, i32) {
    %c0_i32 = arith.constant 0 : i32
    %c0_i32_0 = arith.constant 0 : i32
    %c0_i32_1 = arith.constant 0 : i32
    return %arg0, %c0_i32, %c0_i32_0 : i32, i32, i32
  }
  func.func @transform_1(%arg0: i32) -> (i32, i32) {
    %c0_i32 = arith.constant 0 : i32
    %c0_i32_0 = arith.constant 0 : i32
    %c0_i32_1 = arith.constant 0 : i32
    return %c0_i32, %c0_i32_0 : i32, i32
  }
  func.func @transform_2(%arg0: i32) -> (i32, i32) {
    %c0_i32 = arith.constant 0 : i32
    %c0_i32_0 = arith.constant 0 : i32
    %c0_i32_1 = arith.constant 0 : i32
    return %c0_i32, %c0_i32_0 : i32, i32
  }
  func.func @transform_3(%arg0: i32) -> (i32, i32) {
    %c0_i32 = arith.constant 0 : i32
    %c0_i32_0 = arith.constant 0 : i32
    %c0_i32_1 = arith.constant 0 : i32
    return %c0_i32, %c0_i32_0 : i32, i32
  }
  func.func @transform_4(%arg0: i32) -> (i32, i32) {
    %c0_i32 = arith.constant 0 : i32
    %c0_i32_0 = arith.constant 0 : i32
    %c0_i32_1 = arith.constant 0 : i32
    return %c0_i32, %c0_i32_0 : i32, i32
  }
  func.func @transform_5(%arg0: i32) -> (i32, i32) {
    %c0_i32 = arith.constant 0 : i32
    %c0_i32_0 = arith.constant 0 : i32
    %c0_i32_1 = arith.constant 0 : i32
    return %c0_i32, %c0_i32_0 : i32, i32
  }
  func.func @transform_6(%arg0: i32) -> (i32, i32, i32) {
    %c0_i32 = arith.constant 0 : i32
    %c0_i32_0 = arith.constant 0 : i32
    %c0_i32_1 = arith.constant 0 : i32
    return %arg0, %c0_i32, %c0_i32_0 : i32, i32, i32
  }
  func.func @transform_7(%arg0: i32) -> (i32, i32, i32) {
    %c0_i32 = arith.constant 0 : i32
    %c0_i32_0 = arith.constant 0 : i32
    %c0_i32_1 = arith.constant 0 : i32
    %c0_i32_2 = arith.constant 0 : i32
    return %c0_i32, %c0_i32_0, %c0_i32_1 : i32, i32, i32
  }
}

</mosaic_0001>

<bundles_post_ra>
// kernel: tpu_custom_call.1
= control target key start
LH: loop header
LB: loop body
LE: loop exit
PB: predicated region body
PF: predicated region fallthrough
CT: control target
= control target key end

     0   :  { %13 = vsyncpa [#allocation5], 0  ;;  %s651_s0 = inlined_call_operand.hbm [shape: f32[1,1,32], index: 0, kind: input, shape index: {}]   ;;  %s652_s1 = inlined_call_operand.vmem [shape: f32[1,32], index: 1, kind: input, shape index: {}]   ;;  %s653_s2 = inlined_call_operand.vmem [shape: f32[1,32], index: 2, kind: input, shape index: {}]   ;;  %s654_s3 = inlined_call_operand.hbm [shape: f32[32,128], index: 3, kind: input, shape index: {}]   ;;  %s655_s4 = inlined_call_operand.hbm [shape: f32[32,128], index: 4, kind: input, shape index: {}]   ;;  %s656_s5 = inlined_call_operand.vmem [shape: f32[1,128], index: 5, kind: input, shape index: {}]   ;;  %s657_s6 = inlined_call_operand.hbm [shape: f32[1,1,32], index: 6, kind: output, shape index: {0}]   ;;  %s658_s7 = inlined_call_operand.hbm [shape: f32[2,1,32], index: 7, kind: output, shape index: {1}]  }
   0x1   :  { %14 = vsyncpa [#allocation8], 0 }
   0x2   :  { %15 = vsyncpa [#allocation6], 0 }
   0x3   :  { %16 = vsyncpa [#allocation12], 0  ;;  %s507_s24 = smov [#allocation7]   ;;  %s389_s28 = scalar_lea.hbm %s654_s3, 512 }
   0x4   :  { %s36_s25 = sshll.u32 %s507_s24, 4  ;;  %p390_p0 = scmp.ne.s32.totalorder %s654_s3, %s389_s28  ;;  %s37_s25 = int_to_ptr.vmem [resolvable:$true] %s36_s25 }
   0x5   :  { %p393_p1 = scmp.lt.u32.totalorder %s389_s28, %s654_s3 }
   0x7   :  { %p395_p2 = pnand %p393_p1, %p390_p0 }
   0x9   :  { %398 = shalt.err (!%p395_p2)
}
   0xa   :  { %s399_s10 = scalar_lea.vmem %s37_s25, 512  ;;  %p404_p4 = scmp.lt.s32.totalorder %s37_s25, %s37_s25 }
   0xb   :  { %p400_p3 = scmp.ne.s32.totalorder %s37_s25, %s399_s10  ;;  %p405_p5 = scmp.lt.s32.totalorder %s399_s10, %s399_s10 }
   0xd   :  { %p406_p6 = por %p405_p5, %p404_p4 }
   0xf   :  { %p407_p7 = pnand %p406_p6, %p400_p3 }
  0x11   :  { %410 = shalt.err (!%p407_p7)
}
  0x12   :  { %s508_s11 = smov 128   ;;  %s509_s12 = smov 8  }
  0x13   :  { %42 = dma.hbm_to_vmem [thread:$0]  %s654_s3, 512, %s37_s25, [#allocation8], %s508_s11, %s508_s11, %s509_s12  }
  0x14   :  { %s510_s15 = smov [#allocation4]   ;;  %s511_s17 = smov [#allocation9]  }
  0x15   :  { %s23_s16 = sshll.u32 %s510_s15, 4  ;;  %s48_s18 = sshll.u32 %s511_s17, 4  ;;  %s24_s16 = int_to_ptr.vmem [resolvable:$true] %s23_s16  ;;  %s49_s18 = int_to_ptr.vmem [resolvable:$true] %s48_s18 }
  0x16   :  { %s411_s21 = scalar_lea.hbm %s651_s0, 16 }
  0x17   :  { %p412_p8 = scmp.ne.s32.totalorder %s651_s0, %s411_s21  ;;  %p415_p9 = scmp.lt.u32.totalorder %s411_s21, %s651_s0 }
  0x19   :  { %p417_p10 = pnand %p415_p9, %p412_p8 }
  0x1b   :  { %420 = shalt.err (!%p417_p10)
}
  0x1c   :  { %s421_s3 = scalar_lea.vmem %s24_s16, 16  ;;  %s425_s25 = scalar_lea.vmem %s24_s16, 32 }
  0x1d   :  { %p422_p11 = scmp.ne.s32.totalorder %s24_s16, %s421_s3  ;;  %p426_p12 = scmp.lt.s32.totalorder %s24_s16, %s24_s16 }
  0x1e   :  { %p427_p13 = scmp.lt.s32.totalorder %s425_s25, %s421_s3 }
  0x20   :  { %p428_p0 = por %p427_p13, %p426_p12 }
  0x22   :  { %p429_p1 = pnand %p428_p0, %p422_p11 }
  0x24   :  { %432 = shalt.err (!%p429_p1)
}
  0x25   :  { %26 = dma.hbm_to_vmem [thread:$0]  %s651_s0, 16, %s24_s16, [#allocation5]  }
  0x26   :  { %s433_s8 = scalar_lea.hbm %s655_s4, 512 }
  0x27   :  { %p434_p2 = scmp.ne.s32.totalorder %s655_s4, %s433_s8  ;;  %p437_p3 = scmp.lt.u32.totalorder %s433_s8, %s655_s4 }
  0x29   :  { %p439_p4 = pnand %p437_p3, %p434_p2 }
  0x2b   :  { %442 = shalt.err (!%p439_p4)
}
  0x2c   :  { %s443_s15 = scalar_lea.vmem %s49_s18, 512  ;;  %p448_p6 = scmp.lt.s32.totalorder %s49_s18, %s49_s18 }
  0x2d   :  { %p444_p5 = scmp.ne.s32.totalorder %s49_s18, %s443_s15  ;;  %p449_p7 = scmp.lt.s32.totalorder %s443_s15, %s443_s15 }
  0x2f   :  { %p450_p8 = por %p449_p7, %p448_p6 }
  0x31   :  { %p451_p9 = pnand %p450_p8, %p444_p5 }
  0x33   :  { %454 = shalt.err (!%p451_p9)
}
  0x34   :  { %54 = dma.hbm_to_vmem [thread:$0]  %s655_s4, 512, %s49_s18, [#allocation8], %s508_s11, %s508_s11, %s509_s12  }
  0x35   :  { %499 = dma.done.wait [#allocation5], 16  }
  0x36   :  { %500 = vsyncadd [#allocation5], 4294967280 }
  0x37   :  { %501 = dma.done.wait [#allocation8], 1024  }
  0x38   :  { %502 = vsyncadd [#allocation8], 4294966272  ;;  %v512_v0 = vmov 0.0|0.0   ;;  %vm513_vm0 = vmmov 0   ;;  %v514_v1 = vmov 0.0   ;;  %v76_v2 = vld [vmem:[#allocation7] sm:$0xff]  ;;  %v155_v18 = vlaneseq }
  0x39   :  { %356 = vmatprep.subr.bf16.mxu1 %v512_v0  ;;  %362 = vmatprep.subr.bf16.mxu0 %v512_v0  ;;  %v77_v3 = vld [vmem:[#allocation7 + $0x8] sm:$0xff]  ;;  %v162_v4 = vld [vmem:[#allocation9] sm:$0xff]  ;;  %v78_v7 = vld [vmem:[#allocation7 + $0x10] sm:$0xff]  ;;  %vm71_vm1 = vcmask 253952   ;;  %vm81_vm2 = vcmask 261120   ;;  %s517_s19 = smov 96  }
  0x3a   :  { %342 = vmatprep.mubr.msk.f32.mxu1 %vm513_vm0, %v514_v1  ;;  %353 = vmatprep.mubr.msk.f32.mxu0 %vm513_vm0, %v514_v1  ;;  %v357_v5 = vpack.c.bf16 %v77_v3, %v76_v2  ;;  %v163_v6 = vld [vmem:[#allocation9 + $0x8] sm:$0xff]  ;;  %v79_v8 = vld [vmem:[#allocation7 + $0x18] sm:$0xff]  ;;  %v164_v10 = vld [vmem:[#allocation9 + $0x10] sm:$0xff]  ;;  %v156_v19 = vand.u32 127, %v155_v18  ;;  %s518_s20 = smov [#allocation10]   ;;  %s519_s22 = smov [#allocation11]  }
  0x3b   :  { %v363_v9 = vpack.c.bf16 %v163_v6, %v162_v4  ;;  %v165_v11 = vld [vmem:[#allocation9 + $0x18] sm:$0xff]  ;;  %v360_v12 = vpack.c.bf16 %v79_v8, %v78_v7  ;;  %s295_s21 = sshll.u32 %s518_s20, 4  ;;  %s304_s23 = sshll.u32 %s519_s22, 4  ;;  %s296_s21 = int_to_ptr.vmem [resolvable:$true] %s295_s21  ;;  %s617_s23 = int_to_ptr.vmem [resolvable:$true] %s304_s23 }
  0x3c   :  { %358 = vmatpush3.bf16.msra.mxu1 %v357_v5  ;;  %v70_v13 = vld [vmem:[%s652_s1] sm:$0x1]  ;;  %v366_v14 = vpack.c.bf16 %v165_v11, %v164_v10  ;;  %v75_v15 = vld [vmem:[#allocation4] sm:$0x1]  ;;  %vm157_vm3 = vcmp.ge.s32.totalorder %v156_v19, 64  ;;  %vm158_vm4 = vcmp.lt.s32.totalorder %v156_v19, 96  ;;  %p460_p11 = scmp.lt.s32.totalorder %s296_s21, %s296_s21 }
  0x3d   :  { %364 = vmatpush3.bf16.msra.mxu0 %v363_v9  ;;  %359 = vmatprep.subr.bf16.mxu1 %v512_v0  ;;  %72 = vst.msk [vmem:[#allocation2] sm:$0x1] %vm71_vm1, %v70_v13  ;;  %v73_v17 = vld [vmem:[%s653_s2] sm:$0x1]  ;;  %vm159_vm5 = vmand %vm157_vm3, %vm158_vm4  ;;  %s515_s2 = smov 64   ;;  %s455_s24 = scalar_lea.vmem %s296_s21, 16 }
  0x3e   :  { %365 = vmatprep.subr.bf16.mxu0 %v512_v0  ;;  %74 = vst.msk [vmem:[#allocation3] sm:$0x1] %vm71_vm1, %v73_v17  ;;  %v80_v20 = vld [vmem:[%s656_s5] sm:$0x1]  ;;  %s516_s5 = smov 32   ;;  %p456_p10 = scmp.ne.s32.totalorder %s296_s21, %s455_s24 }
  0x3f   :  { %s459_s26 = scalar_lea.vmem %s296_s21, 32 }
  0x40   :  { %361 = vmatpush3.bf16.msra.mxu1 %v360_v12  ;;  %p461_p12 = scmp.lt.s32.totalorder %s459_s26, %s455_s24 }
  0x41   :  { %367 = vmatpush3.bf16.msra.mxu0 %v366_v14 }
  0x42   :  { %p462_p13 = por %p461_p12, %p460_p11 }
  0x43   :  { %343 = vmatmul.mubr.msk.f32.vlgmr.msra.gmra.mrb[0].mxu1 %vm81_vm2, %v75_v15 }
  0x44   :  { %v160_v16 = vld [vmem:[#allocation2] sm:$0x1]  ;;  %p463_p0 = pnand %p462_p13, %p456_p10 }
  0x45   :  { %354 = vmatmul.mubr.msk.f32.vlgmr.msra.gmra.mrb[0].mxu0 %vm81_vm2, %v160_v16  ;;  %v323_v33 = vld [vmem:[#allocation3] ss:$0 sm:$0xff] }
 0x116   :  { %v151_v21 = vpop.f32.mrb[0].mxu1 }
 0x117   :  { %v152_v22 = vadd.f32 %v151_v21, %v80_v20  ;;  %v344_v23 = vpop.f32.mrb[1].mxu1 }
 0x118   :  { %v235_v24 = vpop.f32.mrb[0].mxu0 }
 0x119   :  { %v239_v25 = vadd.f32 %v235_v24, %v152_v22  ;;  %v355_v26 = vpop.f32.mrb[1].mxu0 }
 0x11b   :  { %v240_v27 = vmul.f32 0.5, %v239_v25 }
 0x11d   :  { %v241_v28 = vsel %vm159_vm5, %v239_v25, %v240_v27 }
 0x11e   :  { %385 = vtanh.f32 %v241_v28 }
 0x128   :  { %v386_v29 = vpop.eup %385 }
 0x129   :  { %v243_v30 = vmul.f32 0.5, %v386_v29 }
 0x12b   :  { %v244_v31 = vadd.f32 0.5, %v243_v30 }
 0x12d   :  { %v245_v32 = vsel %vm159_vm5, %v386_v29, %v244_v31 }
 0x12e   :  { %256 = vrot.lane.b32.xlu0 %v245_v32, %s515_s2 }
 0x132   :  { %251 = vrot.lane.b32.xlu0 %v323_v33, %s516_s5 }
 0x1a0   :  { %v257_v34 = vpop.permute.xlu0 %256 }
 0x1a1   :  { %v259_v35 = vmul.f32 %v257_v34, %v245_v32 }
 0x1a3   :  { %261 = vrot.lane.b32.xlu1 %v259_v35, %s516_s5 }
 0x1a4   :  { %v252_v36 = vpop.permute.xlu0 %251 }
 0x1a5   :  { %v254_v37 = vmul.f32 %v252_v36, %v245_v32 }
 0x215   :  { %v262_v38 = vpop.permute.xlu1 %261 }
 0x216   :  { %v264_v39 = vadd.f32 %v262_v38, %v254_v37 }
 0x218   :  { %387 = vtanh.f32 %v264_v39 }
 0x222   :  { %v388_v40 = vpop.eup %387 }
 0x223   :  { %267 = vrot.lane.b32.xlu1 %v388_v40, %s515_s2 }
 0x227   :  { %278 = vrot.lane.b32.xlu1 %v264_v39, %s517_s19 }
 0x295   :  { %v268_v41 = vpop.permute.xlu1 %267 }
 0x296   :  { %v270_v42 = vmul.f32 %v268_v41, %v245_v32 }
 0x298   :  { %272 = vrot.lane.b32.xlu0 %v270_v42, %s516_s5 }
 0x299   :  { %v279_v43 = vpop.permute.xlu1 %278 }
 0x29a   :  { %281 = vst.msk [vmem:[#allocation3] sm:$0x1] %vm71_vm1, %v279_v43  ;;  %288 = vst.msk [vmem:[#allocation11 + $0x1] sm:$0x1] %vm71_vm1, %v279_v43 }
 0x30a   :  { %v273_v44 = vpop.permute.xlu0 %272 }
 0x30b   :  { %276 = vst.msk [vmem:[#allocation2] sm:$0x1] %vm71_vm1, %v273_v44  ;;  %286 = vst.msk [vmem:[#allocation11] sm:$0x1] %vm71_vm1, %v273_v44 }
 0x30c   :  { %282 = vst.msk [vmem:[#allocation10] sm:$0x1] %vm71_vm1, %v273_v44 }
 0x30d   :  { %466 = shalt.err (!%p463_p0)
}
 0x30e   :  { %s467_s27 = scalar_lea.hbm %s657_s6, 16 }
 0x30f   :  { %p468_p1 = scmp.ne.s32.totalorder %s657_s6, %s467_s27  ;;  %p471_p2 = scmp.lt.u32.totalorder %s467_s27, %s657_s6 }
 0x311   :  { %p473_p3 = pnand %p471_p2, %p468_p1 }
 0x313   :  { %476 = shalt.err (!%p473_p3)
}
 0x314   :  { %298 = dma.vmem_to_hbm [thread:$0]  %s296_s21, 16, %s657_s6, [#allocation6]  }
 0x315   :  { %s477_s13 = scalar_lea.vmem %s617_s23, 32  ;;  %p482_p5 = scmp.lt.s32.totalorder %s617_s23, %s617_s23 }
 0x316   :  { %p478_p4 = scmp.ne.s32.totalorder %s617_s23, %s477_s13  ;;  %p483_p6 = scmp.lt.s32.totalorder %s477_s13, %s477_s13 }
 0x318   :  { %p484_p7 = por %p483_p6, %p482_p5 }
 0x31a   :  { %p485_p8 = pnand %p484_p7, %p478_p4 }
 0x31c   :  { %488 = shalt.err (!%p485_p8)
}
 0x31d   :  { %s489_s0 = scalar_lea.hbm %s658_s7, 32 }
 0x31e   :  { %p490_p9 = scmp.ne.s32.totalorder %s658_s7, %s489_s0  ;;  %p493_p10 = scmp.lt.u32.totalorder %s489_s0, %s658_s7 }
 0x320   :  { %p495_p11 = pnand %p493_p10, %p490_p9 }
 0x322   :  { %498 = shalt.err (!%p495_p11)
}
 0x323   :  { %s520_s6 = smov 16   ;;  %s521_s17 = smov 1  }
 0x324   :  { %310 = dma.vmem_to_hbm [thread:$0]  %s617_s23, 32, %s658_s7, [#allocation12], %s520_s6, %s520_s6, %s521_s17  }
 0x325   :  { %503 = dma.done.wait [#allocation6], 16  }
 0x326   :  { %504 = vsyncadd [#allocation6], 4294967280 }
 0x327   :  { %505 = dma.done.wait [#allocation12], 32  }
 0x328   :  { %506 = vsyncadd [#allocation12], 4294967264 }
 0x329   :  { %317 = vsyncpa [#allocation5], 1 }
 0x32a   :  { %318 = vsyncpa [#allocation8], 1 }
 0x32b   :  { %319 = vsyncpa [#allocation6], 1 }
 0x32c   :  { %320 = vsyncpa [#allocation12], 1 }

</bundles_post_ra>
